<compile_context>
chip_gen: v7x
topology: tpu7x:2x2x1
jax: 0.10.0
libtpu: 0.0.40
codegen_flags: <defaults>
</compile_context>

<pallas_src>
import functools

import jax
import jax.numpy as jnp
from jax import lax
from jax.experimental import pallas as pl
from jax.experimental.pallas import tpu as pltpu

_HALO = 128  # one lane-tile of halo; supports kwidth <= 129


def _round_up(x, m):
    return ((x + m - 1) // m) * m


def _gconv1d_kernel(xc_ref, xh_ref, w_ref, b_ref, alpha_ref, o_ref,
                    xs_ref, rhs_ref, *, kwidth, cin, tm):
    # Stage current tile + halo contiguously in VMEM (two lane-aligned stores).
    xs_ref[:, :tm] = xc_ref[0]
    xs_ref[:, tm:] = xh_ref[0]

    # im2col-in-VMEM: RHS row block k holds the shifted window x[:, k : k + tm].
    for k in range(kwidth):
        rhs_ref[k * cin:(k + 1) * cin, :] = xs_ref[:, k:k + tm]

    # Single fused MXU contraction over (taps x input channels), f32 accumulate,
    # bias folded into the epilogue add (no separate zero-init / add pass).
    a = jnp.dot(w_ref[...], rhs_ref[...],
                preferred_element_type=jnp.float32) + b_ref[...]

    # PReLU epilogue (per-channel slope, broadcast along lanes).
    h = jnp.where(a > 0, a, alpha_ref[...] * a)
    o_ref[0] = h.astype(o_ref.dtype)


def gconv1d_block(x, weight, bias, alpha, kwidth, stride=1, *,
                  tm=1024, compute_dtype=jnp.bfloat16):
    """
    x:      (N, C_in, L)      float32 (PyTorch NCL)
    weight: (fmaps, C_in, K)  float32 (PyTorch Conv1d layout)
    bias:   (fmaps,)
    alpha:  (fmaps,)          PReLU per-channel slope
    returns h: (N, fmaps, L_out) in x.dtype
    """
    N, Cin, L = x.shape
    fmaps = weight.shape[0]
    assert weight.shape == (fmaps, Cin, kwidth)

    # Reflect padding exactly as in the module's forward().
    if stride > 1:
        P0, P1 = kwidth // 2 - 1, kwidth // 2
    else:
        P0, P1 = kwidth // 2, kwidth // 2
    assert P0 < L and P1 < L, "reflect pad width must be < L (same limit as PyTorch)"
    assert kwidth - 1 <= _HALO, "kwidth must be <= 129 for the single-tile halo"

    Lp = L + P0 + P1
    Lc = Lp - kwidth + 1                         # stride-1 ("dense") output length
    L_out = (Lp - kwidth) // stride + 1
    # Guard: wrapper-side subsample of the dense result matches the strided conv.
    assert L_out == -(-Lc // stride), (L_out, Lc, stride)

    cd = jnp.dtype(compute_dtype)
    dsize = cd.itemsize

    # Time tile (lanes): multiple of 128, clamped for short sequences.
    tm = max(128, min(_round_up(tm, 128), _round_up(Lc, 128)))
    if N == 1:
        # v7x has 2 TensorCores: keep at least 2 parallel grid steps when possible.
        tm = min(tm, max(128, _round_up(pl.cdiv(Lc, 2), 128)))

    def footprint(t):
        return (2 * Cin * (t + _HALO) * dsize            # double-buffered inputs
                + 2 * fmaps * t * 4                      # double-buffered f32 output
                + Cin * (t + _HALO) * dsize              # xs scratch
                + kwidth * Cin * t * dsize               # im2col RHS scratch
                + 2 * fmaps * kwidth * Cin * dsize)      # resident weights

    while tm > 128 and footprint(tm) > 24 * 1024 * 1024:
        tm -= 128

    n_t = pl.cdiv(Lc, tm)
    Lpad = n_t * tm + _HALO                      # extra lane-tile so the halo block exists

    # Single fused pad + cast: reflect edges, zero tail and the dtype cast are
    # all produced by ONE concatenate (one HBM materialization of the input).
    pieces = []
    if P0 > 0:
        pieces.append(x[:, :, 1:P0 + 1][:, :, ::-1].astype(cd))
    pieces.append(x.astype(cd))
    if P1 > 0:
        pieces.append(x[:, :, L - 1 - P1:L - 1][:, :, ::-1].astype(cd))
    if Lpad > Lp:
        pieces.append(jnp.zeros((N, Cin, Lpad - Lp), cd))
    x_pad = jnp.concatenate(pieces, axis=-1)

    # Fused tap weights: column block k of (fmaps, K*Cin) holds W[:, :, k].
    w_flat = jnp.transpose(weight, (0, 2, 1)).reshape(fmaps, kwidth * Cin).astype(cd)
    b2 = bias.reshape(fmaps, 1).astype(jnp.float32)
    a2 = alpha.reshape(fmaps, 1).astype(jnp.float32)

    kernel = functools.partial(_gconv1d_kernel, kwidth=kwidth, cin=Cin, tm=tm)

    out_pad = pl.pallas_call(
        kernel,
        out_shape=jax.ShapeDtypeStruct((N, fmaps, n_t * tm), x.dtype),
        grid=(N, n_t),
        in_specs=[
            # current time tile of x
            pl.BlockSpec((1, Cin, tm), lambda n, j: (n, 0, j)),
            # 128-column halo = first lane-tile of the *next* time tile
            pl.BlockSpec((1, Cin, _HALO), lambda n, j: (n, 0, (j + 1) * (tm // _HALO))),
            # weights / bias / alpha stay resident (constant block index)
            pl.BlockSpec((fmaps, kwidth * Cin), lambda n, j: (0, 0)),
            pl.BlockSpec((fmaps, 1), lambda n, j: (0, 0)),
            pl.BlockSpec((fmaps, 1), lambda n, j: (0, 0)),
        ],
        out_specs=pl.BlockSpec((1, fmaps, tm), lambda n, j: (n, 0, j)),
        scratch_shapes=[
            pltpu.VMEM((Cin, tm + _HALO), cd),         # staged tile + halo
            pltpu.VMEM((kwidth * Cin, tm), cd),        # im2col RHS for the fused matmul
        ],
        compiler_params=pltpu.CompilerParams(
            dimension_semantics=("parallel", "parallel"),
            vmem_limit_bytes=32 * 1024 * 1024,
        ),
    )(x_pad, x_pad, w_flat, b2, a2)

    # TODO(synk): stride > 1 is computed densely and subsampled here; an in-kernel
    # strided read (xs_ref[:, pl.ds(k, tm // stride, stride=stride)]) writing a
    # (fmaps, tm // stride) block would halve output HBM writeback for stride=2.
    return out_pad[:, :, :Lc:stride]


def reference_gconv1d(x, weight, bias, alpha, kwidth, stride=1):
    """Pure-JAX reference replicating the PyTorch forward (norm_type=None)."""
    if stride > 1:
        P = (kwidth // 2 - 1, kwidth // 2)
    else:
        P = (kwidth // 2, kwidth // 2)
    x_p = jnp.pad(x, ((0, 0), (0, 0), P), mode="reflect")
    a = lax.conv_general_dilated(
        x_p, weight, window_strides=(stride,), padding="VALID",
        dimension_numbers=("NCH", "OIH", "NCH"))
    a = a + bias[None, :, None]
    h = jnp.where(a > 0, a, alpha[None, :, None] * a)
    return h


if __name__ == "__main__":
    # Small shapes consistent with the module: batch=2, ninp=4, L=16, fmaps=8, kwidth=5
    N, Cin, L = 2, 4, 16
    fmaps, kwidth = 8, 5

    key = jax.random.PRNGKey(0)
    kx, kw, kb = jax.random.split(key, 3)

    x = jax.random.normal(kx, (N, Cin, L), dtype=jnp.float32)

    fan_in = Cin * kwidth
    bound = 1.0 / jnp.sqrt(fan_in)
    weight = jax.random.uniform(kw, (fmaps, Cin, kwidth), jnp.float32, -bound, bound)
    bias = jax.random.uniform(kb, (fmaps,), jnp.float32, -bound, bound)
    # nn.PReLU(fmaps, init=0): slope is learnable; use a nonzero value so the
    # negative branch of the PReLU epilogue is actually exercised.
    alpha = jnp.full((fmaps,), 0.1, jnp.float32)

    for stride in (1, 2):
        h_ref = reference_gconv1d(x, weight, bias, alpha, kwidth, stride)

        # Exact-parity path (f32 compute inside the kernel).
        h32 = jax.block_until_ready(
            gconv1d_block(x, weight, bias, alpha, kwidth, stride,
                          compute_dtype=jnp.float32))
        assert h32.shape == h_ref.shape, (stride, h32.shape, h_ref.shape)
        assert jnp.allclose(h32, h_ref, atol=1e-5, rtol=1e-5), \
            (stride, float(jnp.max(jnp.abs(h32 - h_ref))))

        # Default perf path: bf16 MXU inputs, f32 accumulation (v6e/v7x path).
        h = jax.block_until_ready(
            gconv1d_block(x, weight, bias, alpha, kwidth, stride))
        assert h.shape == h_ref.shape, (stride, h.shape, h_ref.shape)
        assert jnp.allclose(h, h_ref, atol=5e-2, rtol=5e-2), \
            (stride, float(jnp.max(jnp.abs(h - h_ref))))

    print("KERNEL_OK")
</pallas_src>

<mosaic_0001>
module attributes {stable_mosaic.version = 11 : i64} {
  func.func @_gconv1d_kernel(%arg0: i32, %arg1: i32, %arg2: memref<1x4x128xf32, #tpu.memory_space<vmem>>, %arg3: memref<1x4x128xf32, #tpu.memory_space<vmem>>, %arg4: memref<8x20xf32, #tpu.memory_space<vmem>>, %arg5: memref<8x1xf32, #tpu.memory_space<vmem>>, %arg6: memref<8x1xf32, #tpu.memory_space<vmem>>, %arg7: memref<1x8x128xf32, #tpu.memory_space<vmem>>, %arg8: memref<4x256xf32, #tpu.memory_space<vmem>>, %arg9: memref<20x128xf32, #tpu.memory_space<vmem>>) attributes {dimension_semantics = [#tpu.dimension_semantics<parallel>, #tpu.dimension_semantics<parallel>], iteration_bounds = array<i64: 2, 1>, scalar_prefetch = 0 : i64, scratch_operands = 2 : i64, tpu.core_type = #tpu.core_type<tc>, window_params = [{transform_indices = @transform_0, window_bounds = array<i64: 1, 4, 128>}, {transform_indices = @transform_1, window_bounds = array<i64: 1, 4, 128>}, {pipeline_mode = #tpu.pipeline_mode<synchronous>, transform_indices = @transform_2, window_bounds = array<i64: 8, 20>}, {pipeline_mode = #tpu.pipeline_mode<synchronous>, transform_indices = @transform_3, window_bounds = array<i64: 8, 1>}, {pipeline_mode = #tpu.pipeline_mode<synchronous>, transform_indices = @transform_4, window_bounds = array<i64: 8, 1>}, {transform_indices = @transform_5, window_bounds = array<i64: 1, 8, 128>}]} {
    %c0 = arith.constant 0 : index
    %c0_0 = arith.constant 0 : index
    %c0_1 = arith.constant 0 : index
    %0 = vector.load %arg2[%c0, %c0_0, %c0_1] : memref<1x4x128xf32, #tpu.memory_space<vmem>>, vector<1x4x128xf32>
    %1 = vector.shape_cast %0 : vector<1x4x128xf32> to vector<4x128xf32>
    %c0_2 = arith.constant 0 : index
    %c0_3 = arith.constant 0 : index
    %2 = vector.load %arg8[%c0_2, %c0_3] : memref<4x256xf32, #tpu.memory_space<vmem>>, vector<4x128xf32>
    tpu.vector_store %arg8[%c0_2, %c0_3], %1 {strides = array<i32>} : memref<4x256xf32, #tpu.memory_space<vmem>>, vector<4x128xf32>,
    %c0_4 = arith.constant 0 : index
    %c0_5 = arith.constant 0 : index
    %c0_6 = arith.constant 0 : index
    %3 = vector.load %arg3[%c0_4, %c0_5, %c0_6] : memref<1x4x128xf32, #tpu.memory_space<vmem>>, vector<1x4x128xf32>
    %4 = vector.shape_cast %3 : vector<1x4x128xf32> to vector<4x128xf32>
    %c0_7 = arith.constant 0 : index
    %c128 = arith.constant 128 : index
    %5 = vector.load %arg8[%c0_7, %c128] : memref<4x256xf32, #tpu.memory_space<vmem>>, vector<4x128xf32>
    tpu.vector_store %arg8[%c0_7, %c128], %4 {strides = array<i32>} : memref<4x256xf32, #tpu.memory_space<vmem>>, vector<4x128xf32>,
    %c0_8 = arith.constant 0 : index
    %c0_9 = arith.constant 0 : index
    %6 = vector.load %arg8[%c0_8, %c0_9] : memref<4x256xf32, #tpu.memory_space<vmem>>, vector<4x128xf32>
    %c0_10 = arith.constant 0 : index
    %c0_11 = arith.constant 0 : index
    %7 = vector.load %arg9[%c0_10, %c0_11] : memref<20x128xf32, #tpu.memory_space<vmem>>, vector<4x128xf32>
    tpu.vector_store %arg9[%c0_10, %c0_11], %6 {strides = array<i32>} : memref<20x128xf32, #tpu.memory_space<vmem>>, vector<4x128xf32>,
    %c0_12 = arith.constant 0 : index
    %c1 = arith.constant 1 : index
    %8 = vector.load %arg8[%c0_12, %c1] : memref<4x256xf32, #tpu.memory_space<vmem>>, vector<4x128xf32>
    %c4 = arith.constant 4 : index
    %c0_13 = arith.constant 0 : index
    %9 = vector.load %arg9[%c4, %c0_13] : memref<20x128xf32, #tpu.memory_space<vmem>>, vector<4x128xf32>
    tpu.vector_store %arg9[%c4, %c0_13], %8 {strides = array<i32>} : memref<20x128xf32, #tpu.memory_space<vmem>>, vector<4x128xf32>,
    %c0_14 = arith.constant 0 : index
    %c2 = arith.constant 2 : index
    %10 = vector.load %arg8[%c0_14, %c2] : memref<4x256xf32, #tpu.memory_space<vmem>>, vector<4x128xf32>
    %c8 = arith.constant 8 : index
    %c0_15 = arith.constant 0 : index
    %11 = vector.load %arg9[%c8, %c0_15] : memref<20x128xf32, #tpu.memory_space<vmem>>, vector<4x128xf32>
    tpu.vector_store %arg9[%c8, %c0_15], %10 {strides = array<i32>} : memref<20x128xf32, #tpu.memory_space<vmem>>, vector<4x128xf32>,
    %c0_16 = arith.constant 0 : index
    %c3 = arith.constant 3 : index
    %12 = vector.load %arg8[%c0_16, %c3] : memref<4x256xf32, #tpu.memory_space<vmem>>, vector<4x128xf32>
    %c12 = arith.constant 12 : index
    %c0_17 = arith.constant 0 : index
    %13 = vector.load %arg9[%c12, %c0_17] : memref<20x128xf32, #tpu.memory_space<vmem>>, vector<4x128xf32>
    tpu.vector_store %arg9[%c12, %c0_17], %12 {strides = array<i32>} : memref<20x128xf32, #tpu.memory_space<vmem>>, vector<4x128xf32>,
    %c0_18 = arith.constant 0 : index
    %c4_19 = arith.constant 4 : index
    %14 = vector.load %arg8[%c0_18, %c4_19] : memref<4x256xf32, #tpu.memory_space<vmem>>, vector<4x128xf32>
    %c16 = arith.constant 16 : index
    %c0_20 = arith.constant 0 : index
    %15 = vector.load %arg9[%c16, %c0_20] : memref<20x128xf32, #tpu.memory_space<vmem>>, vector<4x128xf32>
    tpu.vector_store %arg9[%c16, %c0_20], %14 {strides = array<i32>} : memref<20x128xf32, #tpu.memory_space<vmem>>, vector<4x128xf32>,
    %c0_21 = arith.constant 0 : index
    %c0_22 = arith.constant 0 : index
    %16 = vector.load %arg4[%c0_21, %c0_22] : memref<8x20xf32, #tpu.memory_space<vmem>>, vector<8x20xf32>
    %c0_23 = arith.constant 0 : index
    %c0_24 = arith.constant 0 : index
    %17 = vector.load %arg9[%c0_23, %c0_24] : memref<20x128xf32, #tpu.memory_space<vmem>>, vector<20x128xf32>
    %cst = arith.constant dense<0.000000e+00> : vector<8x128xf32>
    %18 = tpu.matmul %16, %17, %cst {dimension_numbers = #tpu.dot_dimension_numbers<[1], [0], [0], [1], [0, 0, 1, 1], [], []>} : vector<8x20xf32>, vector<20x128xf32>, vector<8x128xf32> -> vector<8x128xf32>
    %c0_25 = arith.constant 0 : index
    %c0_26 = arith.constant 0 : index
    %19 = vector.load %arg5[%c0_25, %c0_26] : memref<8x1xf32, #tpu.memory_space<vmem>>, vector<8x1xf32>
    %20 = vector.broadcast %19 : vector<8x1xf32> to vector<8x128xf32>
    %21 = arith.addf %18, %20 : vector<8x128xf32>
    %cst_27 = arith.constant 0.000000e+00 : f32
    %22 = vector.broadcast %cst_27 : f32 to vector<8x128xf32>
    %23 = arith.cmpf ogt, %21, %22 : vector<8x128xf32>
    %c0_28 = arith.constant 0 : index
    %c0_29 = arith.constant 0 : index
    %24 = vector.load %arg6[%c0_28, %c0_29] : memref<8x1xf32, #tpu.memory_space<vmem>>, vector<8x1xf32>
    %25 = vector.broadcast %24 : vector<8x1xf32> to vector<8x128xf32>
    %26 = arith.mulf %25, %21 : vector<8x128xf32>
    %27 = arith.select %23, %21, %26 : vector<8x128xi1>, vector<8x128xf32>
    %c0_30 = arith.constant 0 : index
    %c0_31 = arith.constant 0 : index
    %c0_32 = arith.constant 0 : index
    %28 = vector.load %arg7[%c0_30, %c0_31, %c0_32] : memref<1x8x128xf32, #tpu.memory_space<vmem>>, vector<1x8x128xf32>
    %29 = vector.shape_cast %28 : vector<1x8x128xf32> to vector<8x128xf32>
    %30 = vector.shape_cast %27 : vector<8x128xf32> to vector<1x8x128xf32>
    tpu.vector_store %arg7[%c0_30, %c0_31, %c0_32], %30 {strides = array<i32>} : memref<1x8x128xf32, #tpu.memory_space<vmem>>, vector<1x8x128xf32>,
    return
  }
  func.func @transform_0(%arg0: i32, %arg1: i32) -> (i32, i32, i32) {
    %c0_i32 = arith.constant 0 : i32
    %c0_i32_0 = arith.constant 0 : i32
    return %arg0, %c0_i32, %arg1 : i32, i32, i32
  }
  func.func @transform_1(%arg0: i32, %arg1: i32) -> (i32, i32, i32) {
    %c1_i32 = arith.constant 1 : i32
    %0 = arith.addi %arg1, %c1_i32 : i32
    %c1_i32_0 = arith.constant 1 : i32
    %1 = arith.muli %0, %c1_i32_0 : i32
    %c0_i32 = arith.constant 0 : i32
    %c0_i32_1 = arith.constant 0 : i32
    return %arg0, %c0_i32, %1 : i32, i32, i32
  }
  func.func @transform_2(%arg0: i32, %arg1: i32) -> (i32, i32) {
    %c0_i32 = arith.constant 0 : i32
    %c0_i32_0 = arith.constant 0 : i32
    %c0_i32_1 = arith.constant 0 : i32
    return %c0_i32, %c0_i32_0 : i32, i32
  }
  func.func @transform_3(%arg0: i32, %arg1: i32) -> (i32, i32) {
    %c0_i32 = arith.constant 0 : i32
    %c0_i32_0 = arith.constant 0 : i32
    %c0_i32_1 = arith.constant 0 : i32
    return %c0_i32, %c0_i32_0 : i32, i32
  }
  func.func @transform_4(%arg0: i32, %arg1: i32) -> (i32, i32) {
    %c0_i32 = arith.constant 0 : i32
    %c0_i32_0 = arith.constant 0 : i32
    %c0_i32_1 = arith.constant 0 : i32
    return %c0_i32, %c0_i32_0 : i32, i32
  }
  func.func @transform_5(%arg0: i32, %arg1: i32) -> (i32, i32, i32) {
    %c0_i32 = arith.constant 0 : i32
    %c0_i32_0 = arith.constant 0 : i32
    return %arg0, %c0_i32, %arg1 : i32, i32, i32
  }
}

</mosaic_0001>

<bundles_post_ra>
// kernel: tpu_custom_call.1
= control target key start
LH: loop header
LB: loop body
LE: loop exit
PB: predicated region body
PF: predicated region fallthrough
CT: control target
= control target key end

     0   :  { %10 = vsyncpa [#allocation5], 0  ;;  %s1006_s0 = inlined_call_operand.vmem [shape: f32[2,4,256], index: 0, kind: input, shape index: {}]   ;;  %s1007_s1 = inlined_call_operand.hbm [shape: f32[2,4,256], index: 1, kind: input, shape index: {}]   ;;  %s1008_s2 = inlined_call_operand.vmem [shape: f32[8,20], index: 2, kind: input, shape index: {}]   ;;  %s1009_s3 = inlined_call_operand.vmem [shape: f32[8,1], index: 3, kind: input, shape index: {}]   ;;  %s1010_s4 = inlined_call_operand.vmem [shape: f32[8,1], index: 4, kind: input, shape index: {}]   ;;  %s1011_s5 = inlined_call_operand.hbm [shape: f32[2,8,128], index: 5, kind: output, shape index: {}]  }
   0x1   :  { %12 = vsyncpa [#allocation5 + $0x1], 0 }
   0x2   :  { %13 = vsyncpa [#allocation6], 0 }
   0x3   :  { %15 = vsyncpa [#allocation6 + $0x1], 0  ;;  %s820_s18 = smov 0   ;;  %s822_s19 = smov 0  }
   0x4   :  { %s824_s20 = smov 0   ;;  %s826_s21 = smov 0  }
   0x5   :  { %s828_s22 = smov 0   ;;  %s830_s23 = smov 0  }
   0x6 LB: > { %s556_s24 = sadd.s32 4294967295, %s778_s23   ;;  %s557_s25 = sadd.s32 4294967294, %s778_s23   ;;  %s778_s23 = sphi %s830_s23, %s21_s23   ;;  %s774_s22 = sphi %s828_s22, %s1027_s22   ;;  %s770_s21 = sphi %s826_s21, %s1026_s21   ;;  %s766_s20 = sphi %s824_s20, %s1025_s20   ;;  %s762_s19 = sphi %s822_s19, %s1024_s19   ;;  %s758_s18 = sphi %s820_s18, %s1023_s18  }
   0x7   : > { %s33_s26 = sadd.s32 1, %s774_s22  ;;  %s72_s27 = sadd.s32 1, %s766_s20 }
   0x8   : > { %p35_p0 = scmp.ge.s32.totalorder %s33_s26, 2  ;;  %p79_p1 = scmp.ne.s32.totalorder %s766_s20, %s762_s19 }
   0x9   : > { %p80_p2 = scmp.eq.s32.totalorder %s778_s23, 0  ;;  %p85_p3 = scmp.ne.s32.totalorder %s762_s19, %s758_s18 }
   0xa   : > { %s1029_s26 = smov (%p35_p0, %s33_s26), 0  ;;  %p86_p5 = scmp.eq.s32.totalorder %s556_s24, 0 }
   0xb   : > { %p861_p4 = por %p80_p2, %p79_p1  ;;  %s67_s29 = ssub.s32 %s774_s22, %s1029_s26 }
   0xc   : > { %p174_p6 = scmp.eq.s32.totalorder %s556_s24, 1  ;;  %p70_p7 = scmp.eq.s32.totalorder %s67_s29, 0 }
   0xd   : > { %p867_p8 = por %p86_p5, %p85_p3  ;;  %p180_p10 = scmp.eq.s32.totalorder %s557_s25, 1 }
   0xe   : > { %p871_p9 = por %p174_p6, %p79_p1  ;;  %p604_p13 = scmp.lt.s32.totalorder %s778_s23, 2 }
   0xf   : > { %s876_s7 = scalar_select %p70_p7, %s766_s20, %s72_s27  }
  0x10   : > { %s1015_s6 = scalar_select %p871_p9, 1, 0 }
  0x11   : > { %p878_p11 = por %p180_p10, %p85_p3  ;;  %s220_s9 = sand.u32 1, %s766_s20  }
  0x12   : > { %s560_s10 = sshll.u32 %s220_s9, 2  ;;  %s574_s11 = sshll.u32 %s774_s22, 7 }
  0x13   : > { %s1016_s8 = scalar_select %p878_p11, 1, 0 }
  0x14   : > { %s490_s14 = scalar_lea.hbm %s1007_s1, %s574_s11  ;;  %s224_s15 = scalar_lea.vmem [#allocation4], %s560_s10 }
  0x15   : > { %s234_s16 = sshll.u32 %s224_s15, 4  ;;  %s889_s17 = scalar_lea.hbm %s490_s14, 64  ;;  %s891_s16 = int_to_ptr.vmem [resolvable:$true] %s234_s16 }
  0x16   : > { %p895_p0 = pnand %p604_p13, %p861_p4  ;;  %s221_s25 = scalar_lea.sflag [#allocation5], %s220_s9 }
  0x17   : > { %s695_s27 = scalar_lea.hbm %s490_s14, 128  ;;  %s670_s28 = scalar_lea.hbm %s1007_s1, 256 }
  0x18   : > { %p666_p3 = scmp.ne.s32.totalorder %s889_s17, %s695_s27  ;;  %p667_p5 = pneg %p895_p0 }
  0x19   : > { %p671_p4 = scmp.lt.u32.totalorder %s889_s17, %s1007_s1  ;;  %p672_p10 = scmp.lt.u32.totalorder %s670_s28, %s695_s27 }
  0x1a   : > { %p668_p6 = pnand %p667_p5, %p666_p3  ;;  %p674_p12 = scmp.lt.u32.totalorder %s695_s27, %s889_s17 }
  0x1b   : > { %p673_p13 = por %p672_p10, %p671_p4 }
  0x1c   : > { %p669_p7 = pneg %p668_p6 }
  0x1d   : > { %p675_p1 = por %p674_p12, %p673_p13 }
  0x1f   : > { %p676_p2 = pnand %p675_p1, %p669_p7 }
  0x21   : > { %679 = shalt.err (!%p676_p2)
}
  0x22   : > { %s680_s9 = scalar_lea.vmem %s891_s16, 64  ;;  %s780_s13 = smov [#allocation4]  }
  0x23   : > { %p681_p3 = scmp.ne.s32.totalorder %s891_s16, %s680_s9  ;;  %s685_s14 = sshll.u32 %s780_s13, 4  ;;  %s686_s14 = int_to_ptr.vmem [resolvable:$false] %s685_s14 }
  0x24   : > { %s687_s15 = scalar_lea.vmem %s686_s14, 128  ;;  %p688_p9 = scmp.lt.s32.totalorder %s891_s16, %s686_s14 }
  0x25   : > { %p683_p6 = pnand %p681_p3, %p667_p5  ;;  %p689_p4 = scmp.lt.s32.totalorder %s687_s15, %s680_s9 }
  0x27   : > { %p684_p11 = pneg %p683_p6  ;;  %p690_p10 = por %p689_p4, %p688_p9 }
  0x29   : > { %p691_p12 = pnand %p690_p10, %p684_p11 }
  0x2b   : > { %694 = shalt.err (!%p691_p12)
}
  0x2c   : > { %599 = dma.hbm_to_vmem [thread:$0]  (!%p895_p0), %s889_s17, 64, %s891_s16, %s221_s25  }
  0x2d   : > { %p1018_p1 = scmp.lt.s32.totalorder %s778_s23, 3  ;;  %p1019_p2 = scmp.ge.s32.totalorder %s778_s23, 1 }
  0x2f   : > { %p240_p5 = pnand %p1019_p2, %p1018_p1 }
  0x30   : > { %s930_s27 = sand.u32 (!%p240_p5), 1, %s762_s19  }
  0x31   : > { %243 = sbr.rel (%p240_p5) target bundleno = 442 (0x1ba), region = 40  ;;  %s564_s29 = sshll.u32 (!%p240_p5), %s930_s27, 2 }
  0x32   : > { %s246_s10 = scalar_lea.sflag (!%p240_p5), [#allocation5], %s930_s27  ;;  %s249_s28 = scalar_lea.vmem (!%p240_p5), [#allocation4], %s564_s29 }
  0x38   : > { %749 = dma.done.wait (%p867_p8), %s246_s10, 64  }
  0x39   : > { %751 = vsyncadd (%p867_p8), %s246_s10, 4294967232  ;;  %p284_p9 = scmp.lt.s32.totalorder %s770_s21, 1  ;;  %v295_v1 = vld [vmem:[%s249_s28] sm:$0xf]  ;;  %s781_s12 = smov 126   ;;  %v783_v5 = vmov 0.0|0.0  }
  0x3a   : > { %296 = vst [vmem:[#allocation2 + $0x4] sm:$0xf] %v295_v1  ;;  %s782_s30 = smov 127   ;;  %589 = vmatprep.subr.bf16.mxu0 %v783_v5  ;;  %s784_s9 = smov 125   ;;  %vm785_vm0 = vmmov 0   ;;  %v786_v6 = vmov 0.0  }
  0x3b   : > { %s285_s16 = scalar_select %p284_p9, %s770_s21, 1  ;;  %586 = vmatprep.mubr.msk.f32.mxu0 %vm785_vm0, %v786_v6  ;;  %v788_v7 = vmov 0   ;;  %v347_v8 = vld [vmem:[%s1009_s3] sm:$0xff]  ;;  %vm317_vm1 = vcmask 1031168   ;;  %vm306_vm2 = vcmask 1039360   ;;  %vm328_vm3 = vcmask 1022976  }
  0x3c   : > { %s787_s13 = smov 124   ;;  %662 = vset.pattern.permute.xlu0 %v788_v7  ;;  %663 = vset.pattern.permute.xlu1 %v788_v7  ;;  %v432_v9 = vld [vmem:[%s1010_s4] sm:$0xff]  ;;  %vm339_vm4 = vcmask 1014784   ;;  %vm357_vm5 = vcmask 1043456   ;;  %vm353_vm6 = vcmask 162816   ;;  %s571_s24 = sshll.u32 %s770_s21, 7 }
  0x3d   : > { %s575_s17 = sshll.u32 %s285_s16, 3  ;;  %v343_v26 = vld [vmem:[%s1008_s2] sm:$0xff]  ;;  %p1020_p11 = scmp.ne.s32.totalorder %s1015_s6, 0 }
  0x3e   : > { %s291_s11 = scalar_lea.vmem %s1006_s0, %s575_s17  ;;  %s565_s17 = sshll.u32 %s930_s27, 3 }
  0x3f   : > { %v293_v0 = vld [vmem:[%s291_s11] sm:$0xf]  ;;  %s283_s25 = scalar_lea.vmem [#allocation7], %s565_s17  ;;  %s789_s21 = smov [#allocation7]  }
  0x40   : > { %294 = vst [vmem:[#allocation2] sm:$0xf] %v293_v0  ;;  %s456_s11 = sshll.u32 %s283_s25, 4  ;;  %s700_s15 = sshll.u32 %s789_s21, 4  ;;  %s959_s11 = int_to_ptr.vmem [resolvable:$true] %s456_s11  ;;  %s701_s15 = int_to_ptr.vmem [resolvable:$false] %s700_s15 }
  0x41   : > { %s696_s14 = scalar_lea.vmem %s959_s11, 128  ;;  %s702_s29 = scalar_lea.vmem %s701_s15, 256 }
  0x42   : > { %p697_p8 = scmp.ne.s32.totalorder %s959_s11, %s696_s14  ;;  %p703_p13 = scmp.lt.s32.totalorder %s959_s11, %s701_s15 }
  0x43   : > { %p704_p3 = scmp.lt.s32.totalorder %s702_s29, %s696_s14 }
  0x44   : > { %p698_p0 = pnand %p697_p8, %p1020_p11 }
  0x45   : > { %p705_p6 = por %p704_p3, %p703_p13 }
  0x46   : > { %p699_p7 = pneg %p698_p0 }
  0x47   : > { %v310_v2 = vld [vmem:[#allocation2] sm:$0xff] }
  0x48   : > { %v297_v3 = vld [vmem:[#allocation2] sm:$0xf]  ;;  %313 = vrot.lane.b32.xlu1 %v310_v2, %s781_s12  ;;  %v312_v4 = vcombine.high %v310_v2, %v310_v2  ;;  %302 = vrot.lane.b32.xlu0 %v310_v2, %s782_s30  ;;  %p706_p4 = pnand %p705_p6, %p699_p7 }
  0x49   : > { %298 = vst [vmem:[#allocation3] sm:$0xf] %v297_v3 }
  0x4c   : > { %315 = vrot.lane.b32.xlu1 %v312_v4, %s781_s12  ;;  %304 = vrot.lane.b32.xlu0 %v312_v4, %s782_s30 }
  0x50   : > { %326 = vrot.lane.b32.xlu1 %v312_v4, %s784_s9  ;;  %324 = vrot.lane.b32.xlu0 %v310_v2, %s784_s9  ;;  %s957_s9 = scalar_lea.hbm %s1011_s5, %s571_s24 }
  0x54   : > { %337 = vrot.lane.b32.xlu1 %v312_v4, %s787_s13  ;;  %335 = vrot.lane.b32.xlu0 %v310_v2, %s787_s13  ;;  %s442_s13 = scalar_lea.sflag [#allocation6], %s930_s27 }
  0x58   : > { %350 = vperm.xlu0 %662, %v347_v8   ;;  %435 = vperm.xlu1 %663, %v432_v9  }
  0xba   : > { %v314_v10 = vpop.permute.xlu1 %313  ;;  %v303_v11 = vpop.permute.xlu0 %302 }
  0xbe   : > { %v316_v12 = vpop.permute.xlu1 %315  ;;  %v305_v13 = vpop.permute.xlu0 %304 }
  0xbf   : > { %v318_v14 = vsel %vm317_vm1, %v314_v10, %v316_v12  ;;  %v307_v15 = vsel %vm306_vm2, %v303_v11, %v305_v13 }
  0xc0   : > { %320 = vst [vmem:[#allocation3 + $0x8] sm:$0xf] %v318_v14  ;;  %309 = vst [vmem:[#allocation3 + $0x4] sm:$0xf] %v307_v15 }
  0xc2   : > { %v327_v16 = vpop.permute.xlu1 %326  ;;  %v325_v17 = vpop.permute.xlu0 %324 }
  0xc3   : > { %v329_v18 = vsel %vm328_vm3, %v325_v17, %v327_v16 }
  0xc4   : > { %331 = vst [vmem:[#allocation3 + $0xc] sm:$0xf] %v329_v18 }
  0xc6   : > { %v338_v19 = vpop.permute.xlu1 %337  ;;  %v336_v20 = vpop.permute.xlu0 %335 }
  0xc7   : > { %v340_v21 = vsel %vm339_vm4, %v336_v20, %v338_v19  ;;  %v344_v22 = vld [vmem:[#allocation3] sm:$0xff] }
  0xc8   : > { %342 = vst [vmem:[#allocation3 + $0x10] sm:$0xf] %v340_v21 }
  0xcb   : > { %v345_v23 = vld [vmem:[#allocation3 + $0x8] sm:$0xff] }
  0xcc   : > { %v590_v24 = vpack.c.bf16 %v345_v23, %v344_v22 }
  0xce   : > { %591 = vmatpush3.bf16.msra.mxu0 %v590_v24 }
  0xcf   : > { %584 = vmatprep.subr.mxu0 %v786_v6  ;;  %v346_v25 = vld [vmem:[#allocation3 + $0x10] sm:$0xf] }
  0xd2   : > { %585 = vmatpush3.msk.msra.mxu0 %vm357_vm5, %v346_v25 }
  0xd3   : > { %587 = vmatmul.mubr.msk.f32.vlgmr.msra.gmra.mrb[0].mxu0 %vm353_vm6, %v343_v26 }
  0xd7   : > { %v351_v27 = vpop.permute.xlu0 %350  ;;  %v436_v29 = vpop.permute.xlu1 %435 }
 0x1a6   : > { %v427_v28 = vpop.f32.mrb[0].mxu0 }
 0x1a7   : > { %v428_v30 = vadd.f32 %v427_v28, %v351_v27  ;;  %v588_v31 = vpop.f32.mrb[1].mxu0 }
 0x1a9   : > { %vm431_vm7 = vcmp.gt.f32.partialorder %v428_v30, 0.0  ;;  %v438_v32 = vmul.f32 %v436_v29, %v428_v30 }
 0x1ab   : > { %v439_v33 = vsel %vm431_vm7, %v428_v30, %v438_v32 }
 0x1ac   : > { %440 = vst [vmem:[%s283_s25] sm:$0xff] %v439_v33 }
 0x1ad   : > { %709 = shalt.err (!%p706_p4)
}
 0x1ae   : > { %s710_s27 = scalar_lea.hbm %s957_s9, 128  ;;  %s714_s16 = scalar_lea.hbm %s1011_s5, 256 }
 0x1af   : > { %p711_p10 = scmp.ne.s32.totalorder %s957_s9, %s710_s27  ;;  %p715_p2 = scmp.lt.u32.totalorder %s957_s9, %s1011_s5 }
 0x1b0   : > { %p716_p5 = scmp.lt.u32.totalorder %s714_s16, %s710_s27  ;;  %p718_p8 = scmp.lt.u32.totalorder %s710_s27, %s957_s9 }
 0x1b1   : > { %p712_p12 = pnand %p711_p10, %p1020_p11 }
 0x1b2   : > { %p717_p9 = por %p716_p5, %p715_p2 }
 0x1b3   : > { %p713_p1 = pneg %p712_p12 }
 0x1b4   : > { %p719_p0 = por %p718_p8, %p717_p9 }
 0x1b6   : > { %p720_p7 = pnand %p719_p0, %p713_p1 }
 0x1b8   : > { %723 = shalt.err (!%p720_p7)
}
 0x1b9   : > { %594 = dma.vmem_to_hbm [thread:$0]  (%p1020_p11), %s959_s11, 128, %s957_s9, %s442_s13  }
 0x1ba PF: > { %s468_s25 = sand.u32 1, %s758_s18   ;;  %p1021_p13 = scmp.ne.s32.totalorder %s1016_s8, 0 }
 0x1bb   : > { %p1022_p3 = scmp.ge.s32.totalorder %s778_s23, 2  ;;  %s469_s12 = scalar_lea.sflag [#allocation6], %s468_s25 }
 0x1bd   : > { %p601_p6 = pnand %p1022_p3, %p1021_p13 }
 0x1bf   : > { %753 = dma.done.wait (!%p601_p6), %s469_s12, 128  }
 0x1c0   : > { %755 = vsyncadd (!%p601_p6), %s469_s12, 4294967168  ;;  %s21_s23 = sadd.s32 1, %s778_s23   ;;  %s1023_s18 = smov %s762_s19 }
 0x1c1   : > { %p18_p4 = scmp.ge.s32.totalorder %s21_s23, 4   ;;  %s1024_s19 = smov %s766_s20 }
 0x1c2   : > { %s1025_s20 = smov %s876_s7  ;;  %s1026_s21 = smov %s774_s22 }
 0x1c3   : > { %s1027_s22 = smov %s1029_s26  ;;  %20 = sbr.rel (!%p18_p4) target bundleno = 6 (0x6), region = 88 }
 0x1ca   :  { %474 = vsyncpa [#allocation5], 1 }
 0x1cb   :  { %476 = vsyncpa [#allocation5 + $0x1], 1 }
 0x1cc   :  { %477 = vsyncpa [#allocation6], 1 }
 0x1cd   :  { %479 = vsyncpa [#allocation6 + $0x1], 1 }

</bundles_post_ra>
